<compile_context>
chip_gen: v7x
topology: tpu7x:2x2x1
jax: 0.10.0
libtpu: 0.0.40
codegen_flags: <defaults>
</compile_context>

<pallas_src>
from functools import partial

import jax
import jax.numpy as jnp
from jax.experimental import pallas as pl
from jax.experimental.pallas import tpu as pltpu


def _round_up(x, m):
    return (x + m - 1) // m * m


def _lr_kernel(x_ref, w1_ref, b1_ref, w2_ref, b2_ref, o_ref):
    # fc1: cast x to bf16 in-kernel (VPU slack), MXU matmul with f32 accumulation.
    x = x_ref[...].astype(w1_ref.dtype)
    h = jnp.dot(x, w1_ref[...], preferred_element_type=jnp.float32)
    h = jnp.maximum(h + b1_ref[...], 0.0)          # b1 is (1, H) -> broadcasts over rows

    # fc2
    logits = jnp.dot(h.astype(w2_ref.dtype), w2_ref[...],
                     preferred_element_type=jnp.float32)
    logits = logits + b2_ref[...]                   # padded class lanes carry -1e30 bias

    # Numerically stable softmax over the 128-padded class axis (all in f32).
    # Padded lanes: logit ~ -1e30 -> exp underflows to 0 -> denominator unchanged.
    m = jnp.max(logits, axis=-1, keepdims=True)
    e = jnp.exp(logits - m)
    denom = jnp.sum(e, axis=-1, keepdims=True)
    o_ref[...] = (e / denom).astype(o_ref.dtype)    # exact divide: rows sum to 1


def prepare_params(w1, b1, w2, b2, *, param_dtype=jnp.bfloat16):
    """Pad weights/biases once (call this once; weights are static across calls).

    w1: (in_dim, hidden); b1: (hidden,); w2: (hidden, n_class); b2: (n_class,)
    (i.e. the transpose of nn.Linear.weight). Returns padded params + n_class.
    """
    in_dim, hidden = w1.shape
    n_class = w2.shape[1]
    H = _round_up(hidden, 128)
    C = _round_up(n_class, 128)

    w1p = jnp.zeros((in_dim, H), param_dtype).at[:, :hidden].set(w1.astype(param_dtype))
    b1p = jnp.zeros((1, H), jnp.float32).at[0, :hidden].set(b1.astype(jnp.float32))
    w2p = jnp.zeros((H, C), param_dtype).at[:hidden, :n_class].set(w2.astype(param_dtype))
    b2p = jnp.full((1, C), -1e30, jnp.float32).at[0, :n_class].set(b2.astype(jnp.float32))
    return w1p, b1p, w2p, b2p, n_class


@partial(jax.jit, static_argnames=("n_class", "max_tile_b", "out_dtype"))
def logistic_regression_forward(x, w1p, b1p, w2p, b2p, *, n_class,
                                max_tile_b=1024, out_dtype=jnp.float32):
    """x: (B, in_dim) float32. Returns (B, n_class) softmax probabilities."""
    B, in_dim = x.shape
    H = w1p.shape[1]
    C = w2p.shape[1]

    # Batch tile: large (amortize ~0.35us/step), 16-row aligned (native bf16 sublane
    # packing), capped so large batches get >=2 grid steps (megacore on v7x).
    TILE_B = min(max_tile_b, _round_up(B, 16 if B >= 16 else 8))
    if B >= 512:
        TILE_B = min(TILE_B, _round_up(pl.cdiv(B, 2), 16))
    grid = (pl.cdiv(B, TILE_B),)   # ragged last block handled by Pallas (no B padding)

    w_itm = jnp.dtype(w1p.dtype).itemsize
    o_itm = jnp.dtype(out_dtype).itemsize
    bytes_accessed = (B * in_dim * 4                      # x in (f32)
                      + in_dim * H * w_itm + H * C * w_itm  # resident weights
                      + (H + C) * 4                         # biases
                      + B * C * o_itm)                      # out
    flops = 2 * B * (in_dim * H + H * C)

    out_padded = pl.pallas_call(
        _lr_kernel,
        out_shape=jax.ShapeDtypeStruct((B, C), out_dtype),
        grid=grid,
        in_specs=[
            pl.BlockSpec((TILE_B, in_dim), lambda i: (i, 0)),  # streamed batch tile
            pl.BlockSpec((in_dim, H), lambda i: (0, 0)),       # resident weights
            pl.BlockSpec((1, H), lambda i: (0, 0)),            # resident bias
            pl.BlockSpec((H, C), lambda i: (0, 0)),            # resident weights
            pl.BlockSpec((1, C), lambda i: (0, 0)),            # resident bias
        ],
        out_specs=pl.BlockSpec((TILE_B, C), lambda i: (i, 0)),
        compiler_params=pltpu.CompilerParams(
            dimension_semantics=("parallel",)),
        cost_estimate=pl.CostEstimate(
            flops=flops,
            transcendentals=B * C,
            bytes_accessed=bytes_accessed),
    )(x, w1p, b1p, w2p, b2p)

    # Slice off the padded class lanes; inside the jit so XLA fuses it (no extra pass).
    return out_padded[:, :n_class]


def _reference_f32(x, w1, b1, w2, b2):
    h = jnp.maximum(x @ w1 + b1, 0.0)
    logits = h @ w2 + b2
    return jax.nn.softmax(logits, axis=1)


def _reference_mimic(x, w1, b1, w2, b2):
    # Same precision recipe as the kernel (bf16 MXU inputs, f32 accumulation, exact softmax).
    md = jnp.bfloat16
    h = jnp.dot(x.astype(md), w1.astype(md), preferred_element_type=jnp.float32) + b1
    h = jnp.maximum(h, 0.0)
    logits = jnp.dot(h.astype(md), w2.astype(md), preferred_element_type=jnp.float32) + b2
    return jax.nn.softmax(logits, axis=1)


if __name__ == "__main__":
    # Small shapes consistent with the module: in_dim=64 -> hidden=32, n_class=10, batch=8.
    B, in_dim, n_class = 8, 64, 10
    hidden = in_dim // 2

    key = jax.random.PRNGKey(0)
    kx, kw1, kb1, kw2, kb2 = jax.random.split(key, 5)

    x = jax.random.normal(kx, (B, in_dim), dtype=jnp.float32)
    # deterministic "nn.Linear"-style init (uniform scaled by fan-in)
    w1 = jax.random.uniform(kw1, (in_dim, hidden), jnp.float32,
                            -1.0 / jnp.sqrt(in_dim), 1.0 / jnp.sqrt(in_dim))
    b1 = jax.random.uniform(kb1, (hidden,), jnp.float32,
                            -1.0 / jnp.sqrt(in_dim), 1.0 / jnp.sqrt(in_dim))
    w2 = jax.random.uniform(kw2, (hidden, n_class), jnp.float32,
                            -1.0 / jnp.sqrt(hidden), 1.0 / jnp.sqrt(hidden))
    b2 = jax.random.uniform(kb2, (n_class,), jnp.float32,
                            -1.0 / jnp.sqrt(hidden), 1.0 / jnp.sqrt(hidden))

    # Pad weights once (hoisted out of the per-call path).
    w1p, b1p, w2p, b2p, nc = prepare_params(w1, b1, w2, b2)

    out = logistic_regression_forward(x, w1p, b1p, w2p, b2p, n_class=nc)
    out = jax.block_until_ready(out)

    ref_mimic = _reference_mimic(x, w1, b1, w2, b2)
    ref_f32 = _reference_f32(x, w1, b1, w2, b2)

    assert out.shape == (B, n_class)
    assert out.dtype == jnp.float32
    # Tight check vs. a reference with the same precision recipe (bf16 matmul, f32 accum).
    assert jnp.allclose(out, ref_mimic, atol=5e-3, rtol=5e-3), "mismatch vs mimic reference"
    # Loose check vs. the pure-f32 module semantics.
    assert jnp.allclose(out, ref_f32, atol=3e-2, rtol=3e-2), "mismatch vs f32 reference"
    # Exact-divide softmax: rows sum to 1 to f32 precision.
    assert jnp.allclose(jnp.sum(out, axis=1), 1.0, atol=1e-4), "rows must sum to ~1"

    # Optional low-traffic output path (bf16 store halves the write stream).
    out_bf16 = logistic_regression_forward(x, w1p, b1p, w2p, b2p, n_class=nc,
                                           out_dtype=jnp.bfloat16)
    out_bf16 = jax.block_until_ready(out_bf16)
    assert out_bf16.shape == (B, n_class) and out_bf16.dtype == jnp.bfloat16
    assert jnp.allclose(out_bf16.astype(jnp.float32), ref_f32, atol=3e-2, rtol=3e-2)

    print("KERNEL_OK")
</pallas_src>

<mosaic_0001>
module attributes {stable_mosaic.version = 11 : i64} {
  func.func @_lr_kernel(%arg0: i32, %arg1: memref<8x64xf32, #tpu.memory_space<vmem>>, %arg2: memref<64x128xbf16, #tpu.memory_space<vmem>>, %arg3: memref<1x128xf32, #tpu.memory_space<vmem>>, %arg4: memref<128x128xbf16, #tpu.memory_space<vmem>>, %arg5: memref<1x128xf32, #tpu.memory_space<vmem>>, %arg6: memref<8x128xf32, #tpu.memory_space<vmem>>) attributes {dimension_semantics = [#tpu.dimension_semantics<parallel>], iteration_bounds = array<i64: 1>, scalar_prefetch = 0 : i64, scratch_operands = 0 : i64, tpu.core_type = #tpu.core_type<tc>, window_params = [{transform_indices = @transform_0, window_bounds = array<i64: 8, 64>}, {pipeline_mode = #tpu.pipeline_mode<synchronous>, transform_indices = @transform_1, window_bounds = array<i64: 64, 128>}, {pipeline_mode = #tpu.pipeline_mode<synchronous>, transform_indices = @transform_2, window_bounds = array<i64: 1, 128>}, {pipeline_mode = #tpu.pipeline_mode<synchronous>, transform_indices = @transform_3, window_bounds = array<i64: 128, 128>}, {pipeline_mode = #tpu.pipeline_mode<synchronous>, transform_indices = @transform_4, window_bounds = array<i64: 1, 128>}, {transform_indices = @transform_5, window_bounds = array<i64: 8, 128>}]} {
    %c0 = arith.constant 0 : index
    %c0_0 = arith.constant 0 : index
    %0 = vector.load %arg1[%c0, %c0_0] : memref<8x64xf32, #tpu.memory_space<vmem>>, vector<8x64xf32>
    %1 = arith.truncf %0 : vector<8x64xf32> to vector<8x64xbf16>
    %c0_1 = arith.constant 0 : index
    %c0_2 = arith.constant 0 : index
    %2 = vector.load %arg2[%c0_1, %c0_2] : memref<64x128xbf16, #tpu.memory_space<vmem>>, vector<64x128xbf16>
    %cst = arith.constant dense<0.000000e+00> : vector<8x128xf32>
    %3 = tpu.matmul %1, %2, %cst {dimension_numbers = #tpu.dot_dimension_numbers<[1], [0], [0], [1], [0, 0, 1, 1], [], []>} : vector<8x64xbf16>, vector<64x128xbf16>, vector<8x128xf32> -> vector<8x128xf32>
    %c0_3 = arith.constant 0 : index
    %c0_4 = arith.constant 0 : index
    %4 = vector.load %arg3[%c0_3, %c0_4] : memref<1x128xf32, #tpu.memory_space<vmem>>, vector<1x128xf32>
    %5 = vector.broadcast %4 : vector<1x128xf32> to vector<8x128xf32>
    %6 = arith.addf %3, %5 : vector<8x128xf32>
    %cst_5 = arith.constant 0.000000e+00 : f32
    %7 = vector.broadcast %cst_5 : f32 to vector<8x128xf32>
    %8 = arith.maximumf %6, %7 : vector<8x128xf32>
    %9 = arith.truncf %8 : vector<8x128xf32> to vector<8x128xbf16>
    %c0_6 = arith.constant 0 : index
    %c0_7 = arith.constant 0 : index
    %10 = vector.load %arg4[%c0_6, %c0_7] : memref<128x128xbf16, #tpu.memory_space<vmem>>, vector<128x128xbf16>
    %cst_8 = arith.constant dense<0.000000e+00> : vector<8x128xf32>
    %11 = tpu.matmul %9, %10, %cst_8 {dimension_numbers = #tpu.dot_dimension_numbers<[1], [0], [0], [1], [0, 0, 1, 1], [], []>} : vector<8x128xbf16>, vector<128x128xbf16>, vector<8x128xf32> -> vector<8x128xf32>
    %c0_9 = arith.constant 0 : index
    %c0_10 = arith.constant 0 : index
    %12 = vector.load %arg5[%c0_9, %c0_10] : memref<1x128xf32, #tpu.memory_space<vmem>>, vector<1x128xf32>
    %13 = vector.broadcast %12 : vector<1x128xf32> to vector<8x128xf32>
    %14 = arith.addf %11, %13 : vector<8x128xf32>
    %cst_11 = arith.constant dense<0xFF800000> : vector<8xf32>
    %15 = vector.multi_reduction <maximumf>, %14, %cst_11 [1] : vector<8x128xf32> to vector<8xf32>
    %16 = vector.shape_cast %15 : vector<8xf32> to vector<8x1xf32>
    %17 = vector.broadcast %16 : vector<8x1xf32> to vector<8x128xf32>
    %18 = arith.subf %14, %17 : vector<8x128xf32>
    %19 = math.exp %18 : vector<8x128xf32>
    %cst_12 = arith.constant dense<0.000000e+00> : vector<8xf32>
    %20 = vector.multi_reduction <add>, %19, %cst_12 [1] : vector<8x128xf32> to vector<8xf32>
    %21 = vector.shape_cast %20 : vector<8xf32> to vector<8x1xf32>
    %22 = vector.broadcast %21 : vector<8x1xf32> to vector<8x128xf32>
    %23 = arith.divf %19, %22 : vector<8x128xf32>
    %c0_13 = arith.constant 0 : index
    %c0_14 = arith.constant 0 : index
    %24 = vector.load %arg6[%c0_13, %c0_14] : memref<8x128xf32, #tpu.memory_space<vmem>>, vector<8x128xf32>
    tpu.vector_store %arg6[%c0_13, %c0_14], %23 {strides = array<i32>} : memref<8x128xf32, #tpu.memory_space<vmem>>, vector<8x128xf32>,
    return
  }
  func.func @transform_0(%arg0: i32) -> (i32, i32) {
    %c0_i32 = arith.constant 0 : i32
    %c0_i32_0 = arith.constant 0 : i32
    return %arg0, %c0_i32 : i32, i32
  }
  func.func @transform_1(%arg0: i32) -> (i32, i32) {
    %c0_i32 = arith.constant 0 : i32
    %c0_i32_0 = arith.constant 0 : i32
    %c0_i32_1 = arith.constant 0 : i32
    return %c0_i32, %c0_i32_0 : i32, i32
  }
  func.func @transform_2(%arg0: i32) -> (i32, i32) {
    %c0_i32 = arith.constant 0 : i32
    %c0_i32_0 = arith.constant 0 : i32
    %c0_i32_1 = arith.constant 0 : i32
    return %c0_i32, %c0_i32_0 : i32, i32
  }
  func.func @transform_3(%arg0: i32) -> (i32, i32) {
    %c0_i32 = arith.constant 0 : i32
    %c0_i32_0 = arith.constant 0 : i32
    %c0_i32_1 = arith.constant 0 : i32
    return %c0_i32, %c0_i32_0 : i32, i32
  }
  func.func @transform_4(%arg0: i32) -> (i32, i32) {
    %c0_i32 = arith.constant 0 : i32
    %c0_i32_0 = arith.constant 0 : i32
    %c0_i32_1 = arith.constant 0 : i32
    return %c0_i32, %c0_i32_0 : i32, i32
  }
  func.func @transform_5(%arg0: i32) -> (i32, i32) {
    %c0_i32 = arith.constant 0 : i32
    %c0_i32_0 = arith.constant 0 : i32
    return %arg0, %c0_i32 : i32, i32
  }
}

</mosaic_0001>

<bundles_post_ra>
// kernel: logistic_regression_forward.1
= control target key start
LH: loop header
LB: loop body
LE: loop exit
PB: predicated region body
PF: predicated region fallthrough
CT: control target
= control target key end

     0   :  { %10 = vsyncpa [#allocation3], 0  ;;  %s562_s0 = inlined_call_operand.hbm [shape: f32[8,64], index: 0, kind: input, shape index: {}]   ;;  %s563_s1 = inlined_call_operand.hbm [shape: bf16[64,128], index: 1, kind: input, shape index: {}]   ;;  %s564_s2 = inlined_call_operand.vmem [shape: f32[1,128], index: 2, kind: input, shape index: {}]   ;;  %s565_s3 = inlined_call_operand.hbm [shape: bf16[128,128], index: 3, kind: input, shape index: {}]   ;;  %s566_s4 = inlined_call_operand.vmem [shape: f32[1,128], index: 4, kind: input, shape index: {}]   ;;  %s567_s5 = inlined_call_operand.hbm [shape: f32[8,128], index: 5, kind: output, shape index: {}]  }
   0x1   :  { %11 = vsyncpa [#allocation6], 0 }
   0x2   :  { %12 = vsyncpa [#allocation4], 0  ;;  %s464_s18 = smov [#allocation5]   ;;  %s370_s22 = scalar_lea.hbm %s563_s1, 512 }
   0x3   :  { %s28_s19 = sshll.u32 %s464_s18, 4  ;;  %p371_p0 = scmp.ne.s32.totalorder %s563_s1, %s370_s22  ;;  %s29_s19 = int_to_ptr.vmem [resolvable:$true] %s28_s19 }
   0x4   :  { %p374_p1 = scmp.lt.u32.totalorder %s370_s22, %s563_s1 }
   0x6   :  { %p376_p2 = pnand %p374_p1, %p371_p0 }
   0x8   :  { %379 = shalt.err (!%p376_p2)
}
   0x9   :  { %s380_s27 = scalar_lea.vmem %s29_s19, 512  ;;  %p385_p4 = scmp.lt.s32.totalorder %s29_s19, %s29_s19 }
   0xa   :  { %p381_p3 = scmp.ne.s32.totalorder %s29_s19, %s380_s27  ;;  %p386_p5 = scmp.lt.s32.totalorder %s380_s27, %s380_s27 }
   0xc   :  { %p387_p6 = por %p386_p5, %p385_p4 }
   0xe   :  { %p388_p7 = pnand %p387_p6, %p381_p3 }
  0x10   :  { %391 = shalt.err (!%p388_p7)
}
  0x11   :  { %s465_s28 = smov 64   ;;  %s466_s29 = smov 4  }
  0x12   :  { %34 = dma.hbm_to_vmem [thread:$0]  %s563_s1, 512, %s29_s19, [#allocation6], %s465_s28, %s465_s28, %s466_s29  }
  0x13   :  { %s467_s7 = smov [#allocation2]   ;;  %s468_s9 = smov [#allocation7]  }
  0x14   :  { %s19_s8 = sshll.u32 %s467_s7, 4  ;;  %s42_s10 = sshll.u32 %s468_s9, 4  ;;  %s20_s8 = int_to_ptr.vmem [resolvable:$true] %s19_s8  ;;  %s43_s10 = int_to_ptr.vmem [resolvable:$true] %s42_s10 }
  0x15   :  { %s392_s13 = scalar_lea.hbm %s562_s0, 128 }
  0x16   :  { %p393_p8 = scmp.ne.s32.totalorder %s562_s0, %s392_s13  ;;  %p396_p9 = scmp.lt.u32.totalorder %s392_s13, %s562_s0 }
  0x18   :  { %p398_p10 = pnand %p396_p9, %p393_p8 }
  0x1a   :  { %401 = shalt.err (!%p398_p10)
}
  0x1b   :  { %s402_s1 = scalar_lea.vmem %s20_s8, 128  ;;  %p407_p12 = scmp.lt.s32.totalorder %s20_s8, %s20_s8 }
  0x1c   :  { %p403_p11 = scmp.ne.s32.totalorder %s20_s8, %s402_s1  ;;  %p408_p13 = scmp.lt.s32.totalorder %s402_s1, %s402_s1 }
  0x1e   :  { %p409_p0 = por %p408_p13, %p407_p12 }
  0x20   :  { %p410_p1 = pnand %p409_p0, %p403_p11 }
  0x22   :  { %413 = shalt.err (!%p410_p1)
}
  0x23   :  { %22 = dma.hbm_to_vmem [thread:$0]  %s562_s0, 128, %s20_s8, [#allocation3]  }
  0x24   :  { %s414_s22 = scalar_lea.hbm %s565_s3, 1024 }
  0x25   :  { %p415_p2 = scmp.ne.s32.totalorder %s565_s3, %s414_s22  ;;  %p418_p3 = scmp.lt.u32.totalorder %s414_s22, %s565_s3 }
  0x27   :  { %p420_p4 = pnand %p418_p3, %p415_p2 }
  0x29   :  { %423 = shalt.err (!%p420_p4)
}
  0x2a   :  { %s424_s27 = scalar_lea.vmem %s43_s10, 1024  ;;  %p429_p6 = scmp.lt.s32.totalorder %s43_s10, %s43_s10 }
  0x2b   :  { %p425_p5 = scmp.ne.s32.totalorder %s43_s10, %s424_s27  ;;  %p430_p7 = scmp.lt.s32.totalorder %s424_s27, %s424_s27 }
  0x2d   :  { %p431_p8 = por %p430_p7, %p429_p6 }
  0x2f   :  { %p432_p9 = pnand %p431_p8, %p425_p5 }
  0x31   :  { %435 = shalt.err (!%p432_p9)
}
  0x32   :  { %48 = dma.hbm_to_vmem [thread:$0]  %s565_s3, 1024, %s43_s10, [#allocation6], %s465_s28, %s465_s28, %s466_s29  }
  0x33   :  { %458 = dma.done.wait [#allocation3], 128  }
  0x34   :  { %459 = vsyncadd [#allocation3], 4294967168 }
  0x35   :  { %460 = dma.done.wait [#allocation6], 1536  }
  0x36   :  { %461 = vsyncadd [#allocation6], 4294965760  ;;  %v469_v0 = vmov 0.0   ;;  %vm470_vm0 = vmmov 0   ;;  %v354_v1 = vld [vmem:[#allocation5] sm:$0xff]   ;;  %v355_v2 = vld [vmem:[#allocation5 + $0x8] sm:$0xff]  }
  0x37   :  { %314 = vmatprep.subr.bf16.mxu0 %v469_v0  ;;  %322 = vmatprep.mubr.msk.bf16.mxu0 %vm470_vm0, %v469_v0  ;;  %v358_v3 = vld [vmem:[#allocation7] sm:$0xff]   ;;  %v356_v4 = vld [vmem:[#allocation5 + $0x10] sm:$0xff]   ;;  %v359_v5 = vld [vmem:[#allocation7 + $0x8] sm:$0xff]   ;;  %vm102_vm1 = vcmask 523264  }
  0x38   :  { %326 = vmatprep.subr.bf16.mxu1 %v469_v0  ;;  %342 = vmatprep.mubr.msk.bf16.mxu1 %vm470_vm0, %v469_v0  ;;  %v357_v6 = vld [vmem:[#allocation5 + $0x18] sm:$0xff]   ;;  %v360_v8 = vld [vmem:[#allocation7 + $0x10] sm:$0xff]   ;;  %v362_v11 = vld [vmem:[#allocation7 + $0x20] sm:$0xff]  }
  0x39   :  { %315 = vmatpush3.bf16.msra.mxu0 %v354_v1  ;;  %327 = vmatpush3.bf16.msra.mxu1 %v358_v3  ;;  %v61_v7 = vld [vmem:[#allocation2] sm:$0xff]  ;;  %v363_v12 = vld [vmem:[#allocation7 + $0x28] sm:$0xff]   ;;  %v364_v13 = vld [vmem:[#allocation7 + $0x30] sm:$0xff]  }
  0x3a   :  { %316 = vmatprep.subr.bf16.mxu0 %v469_v0  ;;  %328 = vmatprep.subr.bf16.mxu1 %v469_v0  ;;  %v62_v9 = vpack.c.bf16 %v61_v7, %v61_v7  ;;  %v361_v10 = vld [vmem:[#allocation7 + $0x18] sm:$0xff]  }
  0x3b   :  { %v365_v14 = vld [vmem:[#allocation7 + $0x38] sm:$0xff]  }
  0x3c   :  { %v285_v15 = vld [vmem:[%s564_s2] ss:$0 sm:$0xff]  ;;  %s471_s2 = smov [#allocation8]  }
  0x3d   :  { %317 = vmatpush3.bf16.msra.mxu0 %v355_v2  ;;  %329 = vmatpush3.bf16.msra.mxu1 %v359_v5  ;;  %v291_v23 = vld [vmem:[%s566_s4] ss:$0 sm:$0xff]  ;;  %s275_s7 = sshll.u32 %s471_s2, 4  ;;  %s276_s7 = int_to_ptr.vmem [resolvable:$true] %s275_s7 }
  0x3e   :  { %318 = vmatprep.subr.bf16.mxu0 %v469_v0  ;;  %330 = vmatprep.subr.bf16.mxu1 %v469_v0  ;;  %s436_s4 = scalar_lea.vmem %s276_s7, 128  ;;  %p441_p11 = scmp.lt.s32.totalorder %s276_s7, %s276_s7 }
  0x3f   :  { %p437_p10 = scmp.ne.s32.totalorder %s276_s7, %s436_s4  ;;  %p442_p12 = scmp.lt.s32.totalorder %s436_s4, %s436_s4 }
  0x41   :  { %319 = vmatpush3.bf16.msra.mxu0 %v356_v4  ;;  %331 = vmatpush3.bf16.msra.mxu1 %v360_v8  ;;  %p443_p13 = por %p442_p12, %p441_p11 }
  0x42   :  { %320 = vmatprep.subr.bf16.mxu0 %v469_v0  ;;  %332 = vmatprep.subr.bf16.mxu1 %v469_v0 }
  0x43   :  { %p444_p0 = pnand %p443_p13, %p437_p10 }
  0x45   :  { %321 = vmatpush3.bf16.msra.mxu0 %v357_v6  ;;  %333 = vmatpush3.bf16.msra.mxu1 %v361_v10 }
  0x46   :  { %334 = vmatprep.subr.bf16.mxu1 %v469_v0 }
  0x48   :  { %323 = vmatmul.mubr.msk.bf16.vlgmr.msra.gmra.mrb[0].mxu0 %vm102_vm1, %v62_v9 }
  0x49   :  { %335 = vmatpush3.bf16.msra.mxu1 %v362_v11 }
  0x4a   :  { %336 = vmatprep.subr.bf16.mxu1 %v469_v0 }
  0x4d   :  { %337 = vmatpush3.bf16.msra.mxu1 %v363_v12 }
  0x4e   :  { %338 = vmatprep.subr.bf16.mxu1 %v469_v0 }
  0x51   :  { %339 = vmatpush3.bf16.msra.mxu1 %v364_v13 }
  0x52   :  { %340 = vmatprep.subr.bf16.mxu1 %v469_v0 }
  0x55   :  { %341 = vmatpush3.bf16.msra.mxu1 %v365_v14 }
 0x11b   :  { %v140_v16 = vpop.f32.mrb[0].mxu0 }
 0x11c   :  { %v141_v17 = vadd.f32 %v285_v15, %v140_v16  ;;  %v324_v18 = vpop.f32.mrb[1].mxu0 }
 0x11d   :  { %v143_v19 = vpop.f32.mrb[2].mxu0 }
 0x11e   :  { %v146_v20 = vmax.f32 %v141_v17, 0.0  ;;  %v325_v21 = vpop.f32.mrb[3].mxu0 }
 0x120   :  { %v147_v22 = vpack.c.bf16 %v146_v20, %v146_v20 }
 0x122   :  { %343 = vmatmul.mubr.bf16.vlgmr.msra.gmra.mrb[0].mxu1 %v147_v22 }
 0x1f5   :  { %v253_v24 = vpop.f32.mrb[0].mxu1 }
 0x1f6   :  { %v254_v25 = vadd.f32 %v291_v23, %v253_v24  ;;  %v344_v26 = vpop.f32.mrb[1].mxu1 }
 0x1f7   :  { %v256_v27 = vpop.f32.mrb[2].mxu1 }
 0x1f8   :  { %259 = vmax.xlane.f32.xlu0 %v254_v25  ;;  %v345_v28 = vpop.f32.mrb[3].mxu1 }
 0x285   :  { %v260_v29 = vpop.xlane.xlu0 %259 }
 0x286   :  { %v261_v30 = vsub.f32 %v254_v25, %v260_v29 }
 0x288   :  { %v262_v31 = vmul.f32 1.442695, %v261_v30 }
 0x28a   :  { %366 = vpow2.f32 %v262_v31 }
 0x294   :  { %v367_v32 = vpop.eup %366 }
 0x295   :  { %264 = vadd.xlane.f32.xlu0 %v367_v32 }
 0x322   :  { %v265_v33 = vpop.xlane.xlu0 %264 }
 0x323   :  { %368 = vrcp.f32 %v265_v33 }
 0x32d   :  { %v369_v34 = vpop.eup %368 }
 0x32e   :  { %v267_v35 = vmul.f32 %v369_v34, %v367_v32 }
 0x330   :  { %268 = vst [vmem:[#allocation8] sm:$0xff] %v267_v35 }
 0x331   :  { %447 = shalt.err (!%p444_p0)
}
 0x332   :  { %s448_s10 = scalar_lea.hbm %s567_s5, 128 }
 0x333   :  { %p449_p1 = scmp.ne.s32.totalorder %s567_s5, %s448_s10  ;;  %p452_p2 = scmp.lt.u32.totalorder %s448_s10, %s567_s5 }
 0x335   :  { %p454_p3 = pnand %p452_p2, %p449_p1 }
 0x337   :  { %457 = shalt.err (!%p454_p3)
}
 0x338   :  { %278 = dma.vmem_to_hbm [thread:$0]  %s276_s7, 128, %s567_s5, [#allocation4]  }
 0x339   :  { %462 = dma.done.wait [#allocation4], 128  }
 0x33a   :  { %463 = vsyncadd [#allocation4], 4294967168 }
 0x33b   :  { %282 = vsyncpa [#allocation3], 1 }
 0x33c   :  { %283 = vsyncpa [#allocation6], 1 }
 0x33d   :  { %284 = vsyncpa [#allocation4], 1 }

</bundles_post_ra>
